<compile_context>
chip_gen: v7x
topology: tpu7x:2x2x1
jax: 0.10.0
libtpu: 0.0.40
codegen_flags: <defaults>
</compile_context>

<pallas_src>
import functools
import math

import jax
import jax.numpy as jnp
from jax.experimental import pallas as pl
from jax.experimental.pallas import tpu as pltpu

DEFAULT_GRAPH_PAD_ID = -500
LEAKY_SLOPE = 0.01  # nn.LeakyReLU default


def _lcm(a, b):
    return a * b // math.gcd(a, b)


# ----------------------------- Pallas kernel --------------------------------
def _make_projector_kernel(S, TB, nd_mean):
    inv_s = 1.0 / S

    def kernel(x_ref, m_ref, pb1_ref, w1_ref, w2_ref, b2_ref, w3_ref, b3_ref,
               out_ref):
        # x_ref:   (TM, Dg)  bf16 packed rows (TB samples x S slots), PAD rows 0
        # m_ref:   (TM, 1)   f32  1.0 real neighbor / 0.0 PAD slot
        # pb1_ref: (TM, H)   f32  precomputed position_embedding @ w1_pos + b1
        x = x_ref[...]

        # Layer 1: graph part only on the MXU; position part folded into bias.
        h = jnp.dot(x, w1_ref[...], preferred_element_type=jnp.float32)
        h = h + pb1_ref[...]
        h = jnp.maximum(h, LEAKY_SLOPE * h)                 # LeakyReLU (1 vmax)

        # Layer 2
        h = jnp.dot(h.astype(jnp.bfloat16), w2_ref[...],
                    preferred_element_type=jnp.float32) + b2_ref[...]
        h = jnp.maximum(h, LEAKY_SLOPE * h)

        # Layer 3
        y = jnp.dot(h.astype(jnp.bfloat16), w3_ref[...],
                    preferred_element_type=jnp.float32) + b3_ref[...]

        # graph_features[graph_indexes == PAD] = 0.0
        y = y * m_ref[...]                                  # (TM, D_out) f32

        if nd_mean:
            # torch.mean over the S slots: f32 sublane reduction (XLU), no MXU.
            pooled = jnp.sum(y.reshape(TB, S, y.shape[-1]), axis=1) * inv_s
            out_ref[...] = pooled.astype(out_ref.dtype)     # (TB, D_out) f32
        else:
            out_ref[...] = y.astype(out_ref.dtype)          # (TM, D_out) bf16

    return kernel


# -------------------------- one-time (init) prep -----------------------------
def init_linear(key, d_in, d_out):
    """Deterministic nn.Linear-style init; weight stored as (d_in, d_out)."""
    kw, kb = jax.random.split(key)
    bound = 1.0 / math.sqrt(d_in)
    w = jax.random.uniform(kw, (d_in, d_out), jnp.float32, -bound, bound)
    b = jax.random.uniform(kb, (1, d_out), jnp.float32, -bound, bound)
    return w, b


def prepare_projector(params, position_embedding, graph_dim, *, tm_base=256):
    """Init-time prep (cached across calls): split w1 into graph/pos parts,
    fold position_embedding @ w1_pos + b1 into a tiled layer-1 bias, cast
    weights to bf16."""
    w1, b1, w2, b2, w3, b3 = params
    S = position_embedding.shape[0]
    # TM multiple of S (samples never straddle blocks) and 16 (bf16 sublanes),
    # and TB = TM/S a multiple of 8 (pooled output sublane divisibility).
    unit = _lcm(16, 8 * S)
    TM = max(unit, ((tm_base + unit - 1) // unit) * unit)
    TB = TM // S

    w1_graph = w1[:graph_dim]
    w1_pos = w1[graph_dim:]
    pos_bias = position_embedding.astype(jnp.float32) @ w1_pos + b1    # (S, H)
    pos_bias_tiled = jnp.tile(pos_bias, (TB, 1)).astype(jnp.float32)   # (TM, H)

    return (w1_graph.astype(jnp.bfloat16),
            pos_bias_tiled,
            w2.astype(jnp.bfloat16), b2.astype(jnp.float32),
            w3.astype(jnp.bfloat16), b3.astype(jnp.float32))


def _vmem_limit_bytes():
    try:
        cap = pltpu.get_tpu_info().vmem_capacity_bytes
        return min(int(cap) * 3 // 4, 100 * 1024 * 1024)
    except Exception:
        return None  # fall back to the compiler default


# ------------------------------ kernel wrapper -------------------------------
@functools.partial(jax.jit, static_argnames=("nd_mean",))
def run_projector(batch_graph_indexes, graph_embedding, prepared,
                  nd_mean=False):
    """batch_graph_indexes: (S, B) int32 (torch layout, column i = sample i).

    Returns (B, S, D_out) bf16 features (nd_mean=False) or
            (B, 1, D_out) f32 pooled features (nd_mean=True)."""
    w1g, pos_b1, w2, b2, w3, b3 = prepared
    S, B = batch_graph_indexes.shape
    Dg = w1g.shape[0]
    H = w2.shape[0]
    D_out = w3.shape[1]
    TM = pos_b1.shape[0]
    TB = TM // S

    n_blocks = pl.cdiv(B, TB)
    B_pad = n_blocks * TB
    M_pad = n_blocks * TM

    # Pad only the tiny index array; gather + mask + bf16 cast then fuse into a
    # single XLA op producing the packed kernel input (no f32 x round trip).
    gi = jnp.pad(batch_graph_indexes, ((0, 0), (0, B_pad - B)),
                 constant_values=DEFAULT_GRAPH_PAD_ID).T               # (B_pad, S)
    mask = gi != DEFAULT_GRAPH_PAD_ID
    safe = jnp.where(mask, gi, 0)
    x2 = jnp.where(mask[..., None], graph_embedding[safe], 0.0)
    x2 = x2.astype(jnp.bfloat16).reshape(M_pad, Dg)
    m2 = mask.astype(jnp.float32).reshape(M_pad, 1)

    resident = lambda a: pl.BlockSpec(a.shape, lambda i: (0,) * a.ndim)

    if nd_mean:
        out_shape = jax.ShapeDtypeStruct((B_pad, D_out), jnp.float32)
        out_spec = pl.BlockSpec((TB, D_out), lambda i: (i, 0))
        out_bytes = B_pad * D_out * 4
    else:
        out_shape = jax.ShapeDtypeStruct((M_pad, D_out), jnp.bfloat16)
        out_spec = pl.BlockSpec((TM, D_out), lambda i: (i, 0))
        out_bytes = M_pad * D_out * 2

    flops = 2 * M_pad * (Dg * H + H * H + H * D_out)
    bytes_accessed = (M_pad * Dg * 2 + M_pad * 4 + TM * H * 4
                      + (Dg * H + H * H + H * D_out) * 2
                      + (H + D_out) * 4 + out_bytes)

    out = pl.pallas_call(
        _make_projector_kernel(S, TB, nd_mean),
        out_shape=out_shape,
        grid_spec=pltpu.PrefetchScalarGridSpec(
            num_scalar_prefetch=0,
            grid=(n_blocks,),
            in_specs=[
                pl.BlockSpec((TM, Dg), lambda i: (i, 0)),
                pl.BlockSpec((TM, 1), lambda i: (i, 0)),
                resident(pos_b1),
                resident(w1g),
                resident(w2), resident(b2),
                resident(w3), resident(b3),
            ],
            out_specs=out_spec,
        ),
        compiler_params=pltpu.CompilerParams(
            dimension_semantics=("parallel",),
            vmem_limit_bytes=_vmem_limit_bytes()),
        cost_estimate=pl.CostEstimate(
            flops=flops, transcendentals=0, bytes_accessed=bytes_accessed),
    )(x2, m2, pos_b1, w1g, w2, b2, w3, b3)

    if nd_mean:
        return out[:B][:, None, :]                     # (B, 1, D_out) f32
    return out[:B * S].reshape(B, S, D_out)            # (B, S, D_out) bf16


# ------------------------------ pure-JAX reference ---------------------------
def encode_subgraph_neighbordesc_ref(graph_indexes, graph_embedding,
                                     position_embedding, params, nd_mean):
    """f32 reference mirroring the PyTorch method (one sample)."""
    w1, b1, w2, b2, w3, b3 = params
    mask = graph_indexes != DEFAULT_GRAPH_PAD_ID
    safe_idx = jnp.where(mask, graph_indexes, 0)
    ge = graph_embedding[safe_idx] * mask[:, None].astype(jnp.float32)
    x = jnp.concatenate([ge, position_embedding], axis=1)
    h = x @ w1 + b1
    h = jnp.where(h > 0, h, LEAKY_SLOPE * h)
    h = h @ w2 + b2
    h = jnp.where(h > 0, h, LEAKY_SLOPE * h)
    y = h @ w3 + b3
    y = y * mask[:, None].astype(jnp.float32)
    if nd_mean:
        return jnp.mean(y, axis=0, keepdims=True)
    return y


# ----------------------------------- demo ------------------------------------
if __name__ == "__main__":
    key = jax.random.PRNGKey(0)
    k_ge, k_pe, k_l1, k_l2, k_l3, k_idx = jax.random.split(key, 6)

    # Small, TPU-friendly shapes consistent with the module.
    B = 2              # batch size
    S = 8              # neighbor slots (position_embedding rows)
    num_nodes = 32
    graph_dim = 64
    pos_dim = 64
    input_dim = graph_dim + pos_dim     # ND template: concat(graph, position)
    hidden_dim = 128
    output_dim = 128                    # n_linear_layer = 3

    graph_embedding = jax.random.normal(k_ge, (num_nodes, graph_dim), jnp.float32)
    position_embedding = jax.random.normal(k_pe, (S, pos_dim), jnp.float32)

    w1, b1 = init_linear(k_l1, input_dim, hidden_dim)
    w2, b2 = init_linear(k_l2, hidden_dim, hidden_dim)
    w3, b3 = init_linear(k_l3, hidden_dim, output_dim)
    params = (w1, b1, w2, b2, w3, b3)

    # One-time init: split/cast weights, fold position embedding into bias.
    prepared = prepare_projector(params, position_embedding, graph_dim,
                                 tm_base=256)

    # graph indexes per sample, torch layout (S, B), with some PAD slots.
    idx = jax.random.randint(k_idx, (S, B), 0, num_nodes, dtype=jnp.int32)
    pad_pattern = jnp.array([[False, False], [False, False], [False, True],
                             [False, False], [True, False], [False, False],
                             [False, True], [True, False]])
    batch_graph_indexes = jnp.where(pad_pattern, DEFAULT_GRAPH_PAD_ID, idx)

    feat = run_projector(batch_graph_indexes, graph_embedding, prepared,
                         nd_mean=False)
    pooled = run_projector(batch_graph_indexes, graph_embedding, prepared,
                           nd_mean=True)
    feat = jax.block_until_ready(feat)
    pooled = jax.block_until_ready(pooled)

    # Correctness check vs. the pure-f32 reference of the PyTorch method.
    # (bf16 weights/activations + bf16 feature output -> loose tolerance;
    #  this is an intentional precision change.)
    feat_f32 = feat.astype(jnp.float32)
    for i in range(B):
        ref_feat = encode_subgraph_neighbordesc_ref(
            batch_graph_indexes[:, i], graph_embedding, position_embedding,
            params, nd_mean=False)
        ref_pool = encode_subgraph_neighbordesc_ref(
            batch_graph_indexes[:, i], graph_embedding, position_embedding,
            params, nd_mean=True)
        assert jnp.allclose(feat_f32[i], ref_feat, atol=5e-2, rtol=5e-2), (
            "feature mismatch for sample %d" % i)
        assert jnp.allclose(pooled[i], ref_pool, atol=3e-2, rtol=3e-2), (
            "pooled mismatch for sample %d" % i)

    print("KERNEL_OK")
</pallas_src>

<mosaic_0001>
module attributes {stable_mosaic.version = 11 : i64} {
  func.func @kernel(%arg0: i32, %arg1: memref<256x64xbf16, #tpu.memory_space<vmem>>, %arg2: memref<256x1xf32, #tpu.memory_space<vmem>>, %arg3: memref<256x128xf32, #tpu.memory_space<vmem>>, %arg4: memref<64x128xbf16, #tpu.memory_space<vmem>>, %arg5: memref<128x128xbf16, #tpu.memory_space<vmem>>, %arg6: memref<1x128xf32, #tpu.memory_space<vmem>>, %arg7: memref<128x128xbf16, #tpu.memory_space<vmem>>, %arg8: memref<1x128xf32, #tpu.memory_space<vmem>>, %arg9: memref<256x128xbf16, #tpu.memory_space<vmem>>) attributes {dimension_semantics = [#tpu.dimension_semantics<parallel>], iteration_bounds = array<i64: 1>, scalar_prefetch = 0 : i64, scratch_operands = 0 : i64, tpu.core_type = #tpu.core_type<tc>, window_params = [{transform_indices = @transform_0, window_bounds = array<i64: 256, 64>}, {transform_indices = @transform_1, window_bounds = array<i64: 256, 1>}, {pipeline_mode = #tpu.pipeline_mode<synchronous>, transform_indices = @transform_2, window_bounds = array<i64: 256, 128>}, {pipeline_mode = #tpu.pipeline_mode<synchronous>, transform_indices = @transform_3, window_bounds = array<i64: 64, 128>}, {pipeline_mode = #tpu.pipeline_mode<synchronous>, transform_indices = @transform_4, window_bounds = array<i64: 128, 128>}, {pipeline_mode = #tpu.pipeline_mode<synchronous>, transform_indices = @transform_5, window_bounds = array<i64: 1, 128>}, {pipeline_mode = #tpu.pipeline_mode<synchronous>, transform_indices = @transform_6, window_bounds = array<i64: 128, 128>}, {pipeline_mode = #tpu.pipeline_mode<synchronous>, transform_indices = @transform_7, window_bounds = array<i64: 1, 128>}, {transform_indices = @transform_8, window_bounds = array<i64: 256, 128>}]} {
    %c0 = arith.constant 0 : index
    %c0_0 = arith.constant 0 : index
    %0 = vector.load %arg1[%c0, %c0_0] : memref<256x64xbf16, #tpu.memory_space<vmem>>, vector<256x64xbf16>
    %c0_1 = arith.constant 0 : index
    %c0_2 = arith.constant 0 : index
    %1 = vector.load %arg4[%c0_1, %c0_2] : memref<64x128xbf16, #tpu.memory_space<vmem>>, vector<64x128xbf16>
    %cst = arith.constant dense<0.000000e+00> : vector<256x128xf32>
    %2 = tpu.matmul %0, %1, %cst {dimension_numbers = #tpu.dot_dimension_numbers<[1], [0], [0], [1], [0, 0, 1, 1], [], []>} : vector<256x64xbf16>, vector<64x128xbf16>, vector<256x128xf32> -> vector<256x128xf32>
    %c0_3 = arith.constant 0 : index
    %c0_4 = arith.constant 0 : index
    %3 = vector.load %arg3[%c0_3, %c0_4] : memref<256x128xf32, #tpu.memory_space<vmem>>, vector<256x128xf32>
    %4 = arith.addf %2, %3 : vector<256x128xf32>
    %cst_5 = arith.constant 0.00999999977 : f32
    %5 = vector.broadcast %cst_5 : f32 to vector<256x128xf32>
    %6 = arith.mulf %5, %4 : vector<256x128xf32>
    %7 = arith.maximumf %4, %6 : vector<256x128xf32>
    %8 = arith.truncf %7 : vector<256x128xf32> to vector<256x128xbf16>
    %c0_6 = arith.constant 0 : index
    %c0_7 = arith.constant 0 : index
    %9 = vector.load %arg5[%c0_6, %c0_7] : memref<128x128xbf16, #tpu.memory_space<vmem>>, vector<128x128xbf16>
    %cst_8 = arith.constant dense<0.000000e+00> : vector<256x128xf32>
    %10 = tpu.matmul %8, %9, %cst_8 {dimension_numbers = #tpu.dot_dimension_numbers<[1], [0], [0], [1], [0, 0, 1, 1], [], []>} : vector<256x128xbf16>, vector<128x128xbf16>, vector<256x128xf32> -> vector<256x128xf32>
    %c0_9 = arith.constant 0 : index
    %c0_10 = arith.constant 0 : index
    %11 = vector.load %arg6[%c0_9, %c0_10] : memref<1x128xf32, #tpu.memory_space<vmem>>, vector<1x128xf32>
    %12 = vector.broadcast %11 : vector<1x128xf32> to vector<256x128xf32>
    %13 = arith.addf %10, %12 : vector<256x128xf32>
    %cst_11 = arith.constant 0.00999999977 : f32
    %14 = vector.broadcast %cst_11 : f32 to vector<256x128xf32>
    %15 = arith.mulf %14, %13 : vector<256x128xf32>
    %16 = arith.maximumf %13, %15 : vector<256x128xf32>
    %17 = arith.truncf %16 : vector<256x128xf32> to vector<256x128xbf16>
    %c0_12 = arith.constant 0 : index
    %c0_13 = arith.constant 0 : index
    %18 = vector.load %arg7[%c0_12, %c0_13] : memref<128x128xbf16, #tpu.memory_space<vmem>>, vector<128x128xbf16>
    %cst_14 = arith.constant dense<0.000000e+00> : vector<256x128xf32>
    %19 = tpu.matmul %17, %18, %cst_14 {dimension_numbers = #tpu.dot_dimension_numbers<[1], [0], [0], [1], [0, 0, 1, 1], [], []>} : vector<256x128xbf16>, vector<128x128xbf16>, vector<256x128xf32> -> vector<256x128xf32>
    %c0_15 = arith.constant 0 : index
    %c0_16 = arith.constant 0 : index
    %20 = vector.load %arg8[%c0_15, %c0_16] : memref<1x128xf32, #tpu.memory_space<vmem>>, vector<1x128xf32>
    %21 = vector.broadcast %20 : vector<1x128xf32> to vector<256x128xf32>
    %22 = arith.addf %19, %21 : vector<256x128xf32>
    %c0_17 = arith.constant 0 : index
    %c0_18 = arith.constant 0 : index
    %23 = vector.load %arg2[%c0_17, %c0_18] : memref<256x1xf32, #tpu.memory_space<vmem>>, vector<256x1xf32>
    %24 = vector.broadcast %23 : vector<256x1xf32> to vector<256x128xf32>
    %25 = arith.mulf %22, %24 : vector<256x128xf32>
    %26 = arith.truncf %25 : vector<256x128xf32> to vector<256x128xbf16>
    %c0_19 = arith.constant 0 : index
    %c0_20 = arith.constant 0 : index
    %27 = vector.load %arg9[%c0_19, %c0_20] : memref<256x128xbf16, #tpu.memory_space<vmem>>, vector<256x128xbf16>
    tpu.vector_store %arg9[%c0_19, %c0_20], %26 {strides = array<i32>} : memref<256x128xbf16, #tpu.memory_space<vmem>>, vector<256x128xbf16>,
    return
  }
  func.func @transform_0(%arg0: i32) -> (i32, i32) {
    %c0_i32 = arith.constant 0 : i32
    %c0_i32_0 = arith.constant 0 : i32
    return %arg0, %c0_i32 : i32, i32
  }
  func.func @transform_1(%arg0: i32) -> (i32, i32) {
    %c0_i32 = arith.constant 0 : i32
    %c0_i32_0 = arith.constant 0 : i32
    return %arg0, %c0_i32 : i32, i32
  }
  func.func @transform_2(%arg0: i32) -> (i32, i32) {
    %c0_i32 = arith.constant 0 : i32
    %c0_i32_0 = arith.constant 0 : i32
    %c0_i32_1 = arith.constant 0 : i32
    return %c0_i32, %c0_i32_0 : i32, i32
  }
  func.func @transform_3(%arg0: i32) -> (i32, i32) {
    %c0_i32 = arith.constant 0 : i32
    %c0_i32_0 = arith.constant 0 : i32
    %c0_i32_1 = arith.constant 0 : i32
    return %c0_i32, %c0_i32_0 : i32, i32
  }
  func.func @transform_4(%arg0: i32) -> (i32, i32) {
    %c0_i32 = arith.constant 0 : i32
    %c0_i32_0 = arith.constant 0 : i32
    %c0_i32_1 = arith.constant 0 : i32
    return %c0_i32, %c0_i32_0 : i32, i32
  }
  func.func @transform_5(%arg0: i32) -> (i32, i32) {
    %c0_i32 = arith.constant 0 : i32
    %c0_i32_0 = arith.constant 0 : i32
    %c0_i32_1 = arith.constant 0 : i32
    return %c0_i32, %c0_i32_0 : i32, i32
  }
  func.func @transform_6(%arg0: i32) -> (i32, i32) {
    %c0_i32 = arith.constant 0 : i32
    %c0_i32_0 = arith.constant 0 : i32
    %c0_i32_1 = arith.constant 0 : i32
    return %c0_i32, %c0_i32_0 : i32, i32
  }
  func.func @transform_7(%arg0: i32) -> (i32, i32) {
    %c0_i32 = arith.constant 0 : i32
    %c0_i32_0 = arith.constant 0 : i32
    %c0_i32_1 = arith.constant 0 : i32
    return %c0_i32, %c0_i32_0 : i32, i32
  }
  func.func @transform_8(%arg0: i32) -> (i32, i32) {
    %c0_i32 = arith.constant 0 : i32
    %c0_i32_0 = arith.constant 0 : i32
    return %arg0, %c0_i32 : i32, i32
  }
}

</mosaic_0001>

<bundles_post_ra>
// kernel: run_projector.1
= control target key start
LH: loop header
LB: loop body
LE: loop exit
PB: predicated region body
PF: predicated region fallthrough
CT: control target
= control target key end

     0   :  { %vm206_vm0 = vcmask 523264   ;;  %s2388_s3 = inlined_call_operand.vmem [shape: bf16[64,128], index: 3, kind: input, shape index: {}]   ;;  %s2389_s0 = inlined_call_operand.vmem [shape: bf16[256,64], index: 0, kind: input, shape index: {}]   ;;  %s2390_s4 = inlined_call_operand.vmem [shape: bf16[128,128], index: 4, kind: input, shape index: {}]   ;;  %s2391_s6 = inlined_call_operand.vmem [shape: bf16[128,128], index: 6, kind: input, shape index: {}]   ;;  %s2392_s2 = inlined_call_operand.vmem [shape: f32[256,128], index: 2, kind: input, shape index: {}]   ;;  %s2393_s1 = inlined_call_operand.vmem [shape: f32[256,1], index: 1, kind: input, shape index: {}]   ;;  %s2394_s5 = inlined_call_operand.vmem [shape: f32[1,128], index: 5, kind: input, shape index: {}]   ;;  %s2395_s7 = inlined_call_operand.vmem [shape: f32[1,128], index: 7, kind: input, shape index: {}]   ;;  %s2396_s8 = inlined_call_operand.vmem [shape: bf16[256,128], index: 8, kind: output, shape index: {}]  }
   0x1   :  { %v1856_v0 = vld [vmem:[%s2388_s3] sm:$0xff]   ;;  %v1857_v1 = vld [vmem:[%s2388_s3 + $0x8] sm:$0xff]   ;;  %v1858_v2 = vld [vmem:[%s2388_s3 + $0x10] sm:$0xff]  }
   0x2   :  { %1709 = vmatprep.subr.bf16.mxu0 %v1856_v0  ;;  %1845 = vmatprep.subr.bf16.mxu1 %v1856_v0  ;;  %v1860_v3 = vld [vmem:[%s2389_s0] sm:$0xff]   ;;  %v1859_v4 = vld [vmem:[%s2388_s3 + $0x18] sm:$0xff]   ;;  %v1861_v5 = vld [vmem:[%s2389_s0 + $0x8] sm:$0xff]  }
   0x3   :  { %1710 = vmatpush3.bf16.msra.mxu0 %v1856_v0  ;;  %1849 = vmatpush3.bf16.msra.mxu1 %v1856_v0  ;;  %v1868_v6 = vld [vmem:[%s2389_s0 + $0x40] sm:$0xff]   ;;  %v1862_v7 = vld [vmem:[%s2389_s0 + $0x10] sm:$0xff]   ;;  %v1869_v8 = vld [vmem:[%s2389_s0 + $0x48] sm:$0xff]  }
   0x4   :  { %1711 = vmatprep.subr.bf16.mxu0 %v1857_v1  ;;  %1846 = vmatprep.subr.bf16.mxu1 %v1857_v1  ;;  %v1870_v9 = vld [vmem:[%s2389_s0 + $0x50] sm:$0xff]   ;;  %v1863_v10 = vld [vmem:[%s2389_s0 + $0x18] sm:$0xff]   ;;  %v1876_v11 = vld [vmem:[%s2390_s4] sm:$0xff]  }
   0x5   :  { %1717 = vmatprep.mubr.msk.bf16.mxu0 %vm206_vm0, %v1860_v3  ;;  %1733 = vmatprep.mubr.msk.bf16.mxu1 %vm206_vm0, %v1868_v6  ;;  %v1864_v12 = vld [vmem:[%s2389_s0 + $0x20] sm:$0xff]   ;;  %v1877_v13 = vld [vmem:[%s2390_s4 + $0x8] sm:$0xff]   ;;  %v1871_v14 = vld [vmem:[%s2389_s0 + $0x58] sm:$0xff]  }
   0x6   :  { %v1872_v15 = vld [vmem:[%s2389_s0 + $0x60] sm:$0xff]   ;;  %v1878_v16 = vld [vmem:[%s2390_s4 + $0x10] sm:$0xff]   ;;  %v1879_v17 = vld [vmem:[%s2390_s4 + $0x18] sm:$0xff]  }
   0x7   :  { %1712 = vmatpush3.bf16.msra.mxu0 %v1857_v1  ;;  %1850 = vmatpush3.bf16.msra.mxu1 %v1857_v1  ;;  %v1865_v18 = vld [vmem:[%s2389_s0 + $0x28] sm:$0xff]   ;;  %v1866_v20 = vld [vmem:[%s2389_s0 + $0x30] sm:$0xff]   ;;  %v1880_v22 = vld [vmem:[%s2390_s4 + $0x20] sm:$0xff]  }
   0x8   :  { %1713 = vmatprep.subr.bf16.mxu0 %v1858_v2  ;;  %1847 = vmatprep.subr.bf16.mxu1 %v1858_v2  ;;  %v1873_v19 = vld [vmem:[%s2389_s0 + $0x68] sm:$0xff]   ;;  %v1874_v21 = vld [vmem:[%s2389_s0 + $0x70] sm:$0xff]   ;;  %v1867_v23 = vld [vmem:[%s2389_s0 + $0x38] sm:$0xff]  }
   0x9   :  { %v1875_v24 = vld [vmem:[%s2389_s0 + $0x78] sm:$0xff]   ;;  %v1881_v25 = vld [vmem:[%s2390_s4 + $0x28] sm:$0xff]   ;;  %v1882_v26 = vld [vmem:[%s2390_s4 + $0x30] sm:$0xff]  }
   0xa   :  { %v1883_v27 = vld [vmem:[%s2390_s4 + $0x38] sm:$0xff]   ;;  %v1884_v28 = vld [vmem:[%s2391_s6] sm:$0xff]   ;;  %v1885_v29 = vld [vmem:[%s2391_s6 + $0x8] sm:$0xff]  }
   0xb   :  { %1714 = vmatpush3.bf16.msra.mxu0 %v1858_v2  ;;  %1851 = vmatpush3.bf16.msra.mxu1 %v1858_v2  ;;  %v1886_v30 = vld [vmem:[%s2391_s6 + $0x10] sm:$0xff]   ;;  %v1887_v31 = vld [vmem:[%s2391_s6 + $0x18] sm:$0xff]   ;;  %v1888_v32 = vld [vmem:[%s2391_s6 + $0x20] sm:$0xff]  }
   0xc   :  { %1715 = vmatprep.subr.bf16.mxu0 %v1859_v4  ;;  %1848 = vmatprep.subr.bf16.mxu1 %v1859_v4  ;;  %v72_v33 = vld [vmem:[%s2392_s2 + $0x10] sm:$0xff]  ;;  %v70_v35 = vld [vmem:[%s2392_s2] sm:$0xff]  ;;  %v73_v38 = vld [vmem:[%s2392_s2 + $0x18] sm:$0xff] }
   0xd   :  { %v88_v34 = vld [vmem:[%s2392_s2 + $0x90] sm:$0xff]  ;;  %v86_v36 = vld [vmem:[%s2392_s2 + $0x80] sm:$0xff]  ;;  %v89_v40 = vld [vmem:[%s2392_s2 + $0x98] sm:$0xff] }
   0xe   :  { %v71_v43 = vld [vmem:[%s2392_s2 + $0x8] sm:$0xff]  ;;  %v76_v1 = vld [vmem:[%s2392_s2 + $0x30] sm:$0xff] }
   0xf   :  { %1716 = vmatpush3.bf16.msra.mxu0 %v1859_v4  ;;  %1852 = vmatpush3.bf16.msra.mxu1 %v1859_v4  ;;  %v87_v46 = vld [vmem:[%s2392_s2 + $0x88] sm:$0xff]  ;;  %v92_v4 = vld [vmem:[%s2392_s2 + $0xb0] sm:$0xff] }
  0x10   :  { %1749 = vmatprep.subr.bf16.mxu1 %v1876_v11  ;;  %1797 = vmatprep.subr.bf16.mxu0 %v1884_v28 }
  0x12   :  { %1718 = vmatmul.mubr.msk.bf16.vlgmr.msra.gmra.mrb[0].mxu0 %vm206_vm0, %v1861_v5  ;;  %1734 = vmatmul.mubr.msk.bf16.vlgmr.msra.gmra.mrb[0].mxu1 %vm206_vm0, %v1869_v8 }
  0x13   :  { %1721 = vmatprep.mubr.msk.bf16.mxu0 %vm206_vm0, %v1862_v7  ;;  %1737 = vmatprep.mubr.msk.bf16.mxu1 %vm206_vm0, %v1870_v9  ;;  %v74_v7 = vld [vmem:[%s2392_s2 + $0x20] sm:$0xff] }
  0x14   :  { %1750 = vmatpush3.bf16.msra.mxu1 %v1876_v11  ;;  %1798 = vmatpush3.bf16.msra.mxu0 %v1884_v28  ;;  %v90_v9 = vld [vmem:[%s2392_s2 + $0xa0] sm:$0xff] }
  0x15   :  { %1751 = vmatprep.subr.bf16.mxu1 %v1877_v13  ;;  %1799 = vmatprep.subr.bf16.mxu0 %v1885_v29 }
  0x18   :  { %1752 = vmatpush3.bf16.msra.mxu1 %v1877_v13  ;;  %1800 = vmatpush3.bf16.msra.mxu0 %v1885_v29  ;;  %v77_v13 = vld [vmem:[%s2392_s2 + $0x38] sm:$0xff] }
  0x19   :  { %1753 = vmatprep.subr.bf16.mxu1 %v1878_v16  ;;  %1801 = vmatprep.subr.bf16.mxu0 %v1886_v30 }
  0x1a   :  { %1722 = vmatmul.mubr.msk.bf16.gmra.mrb[4].mxu0 %vm206_vm0, %v1863_v10  ;;  %1738 = vmatmul.mubr.msk.bf16.gmra.mrb[4].mxu1 %vm206_vm0, %v1871_v14 }
  0x1b   :  { %1725 = vmatprep.mubr.msk.bf16.mxu0 %vm206_vm0, %v1864_v12  ;;  %1741 = vmatprep.mubr.msk.bf16.mxu1 %vm206_vm0, %v1872_v15 }
  0x1c   :  { %1754 = vmatpush3.bf16.msra.mxu1 %v1878_v16  ;;  %1802 = vmatpush3.bf16.msra.mxu0 %v1886_v30  ;;  %v93_v16 = vld [vmem:[%s2392_s2 + $0xb8] sm:$0xff] }
  0x1d   :  { %1755 = vmatprep.subr.bf16.mxu1 %v1879_v17  ;;  %1803 = vmatprep.subr.bf16.mxu0 %v1887_v31 }
  0x20   :  { %1756 = vmatpush3.bf16.msra.mxu1 %v1879_v17  ;;  %1804 = vmatpush3.bf16.msra.mxu0 %v1887_v31 }
  0x21   :  { %1757 = vmatprep.subr.bf16.mxu1 %v1880_v22  ;;  %1805 = vmatprep.subr.bf16.mxu0 %v1888_v32 }
  0x22   :  { %1726 = vmatmul.mubr.msk.bf16.gmra.mrb[8].mxu0 %vm206_vm0, %v1865_v18  ;;  %1742 = vmatmul.mubr.msk.bf16.gmra.mrb[8].mxu1 %vm206_vm0, %v1873_v19 }
  0x23   :  { %1729 = vmatprep.mubr.msk.bf16.mxu0 %vm206_vm0, %v1866_v20  ;;  %1745 = vmatprep.mubr.msk.bf16.mxu1 %vm206_vm0, %v1874_v21  ;;  %v75_v20 = vld [vmem:[%s2392_s2 + $0x28] sm:$0xff] }
  0x24   :  { %1758 = vmatpush3.bf16.msra.mxu1 %v1880_v22  ;;  %1806 = vmatpush3.bf16.msra.mxu0 %v1888_v32 }
  0x25   :  { %1759 = vmatprep.subr.bf16.mxu1 %v1881_v25 }
  0x28   :  { %1760 = vmatpush3.bf16.msra.mxu1 %v1881_v25 }
  0x29   :  { %1761 = vmatprep.subr.bf16.mxu1 %v1882_v26 }
  0x2a   :  { %1730 = vmatmul.mubr.msk.bf16.gmra.mrb[12].mxu0 %vm206_vm0, %v1867_v23  ;;  %1746 = vmatmul.mubr.msk.bf16.gmra.mrb[12].mxu1 %vm206_vm0, %v1875_v24  ;;  %v91_v23 = vld [vmem:[%s2392_s2 + $0xa8] sm:$0xff] }
  0x2c   :  { %1762 = vmatpush3.bf16.msra.mxu1 %v1882_v26 }
  0x2d   :  { %1763 = vmatprep.subr.bf16.mxu1 %v1883_v27 }
  0x30   :  { %1764 = vmatpush3.bf16.msra.mxu1 %v1883_v27 }
  0xe5   :  { %v1719_v37 = vpop.f32.mrb[0].mxu0  ;;  %v1735_v39 = vpop.f32.mrb[0].mxu1 }
  0xe6   :  { %v298_v41 = vadd.f32 %v1719_v37, %v72_v33  ;;  %v289_v42 = vpop.f32.mrb[1].mxu0  ;;  %v362_v44 = vadd.f32 %v1735_v39, %v88_v34  ;;  %v353_v45 = vpop.f32.mrb[1].mxu1 }
  0xe7   :  { %v290_v47 = vadd.f32 %v289_v42, %v70_v35  ;;  %v1720_v48 = vpop.f32.mrb[2].mxu0  ;;  %v354_v49 = vadd.f32 %v353_v45, %v86_v36  ;;  %v1736_v50 = vpop.f32.mrb[2].mxu1  ;;  %v80_v45 = vld [vmem:[%s2392_s2 + $0x50] sm:$0xff] }
  0xe8   :  { %v418_v51 = vmul.f32 0.01, %v298_v41  ;;  %v301_v52 = vadd.f32 %v1720_v48, %v73_v38  ;;  %v292_v53 = vpop.f32.mrb[3].mxu0  ;;  %v434_v54 = vmul.f32 0.01, %v362_v44  ;;  %v365_v55 = vadd.f32 %v1736_v50, %v89_v40  ;;  %v356_v56 = vpop.f32.mrb[3].mxu1 }
  0xe9   :  { %v416_v57 = vmul.f32 0.01, %v290_v47  ;;  %v293_v58 = vadd.f32 %v292_v53, %v71_v43  ;;  %v432_v59 = vmul.f32 0.01, %v354_v49  ;;  %v357_v60 = vadd.f32 %v356_v56, %v87_v46  ;;  %v96_v48 = vld [vmem:[%s2392_s2 + $0xd0] sm:$0xff]  ;;  %v94_v53 = vld [vmem:[%s2392_s2 + $0xc0] sm:$0xff] }
  0xea   :  { %v419_v61 = vmul.f32 0.01, %v301_v52  ;;  %v466_v62 = vmax.f32 %v362_v44, %v434_v54  ;;  %v435_v63 = vmul.f32 0.01, %v365_v55  ;;  %v450_v5 = vmax.f32 %v298_v41, %v418_v51  ;;  %v78_v51 = vld [vmem:[%s2392_s2 + $0x40] sm:$0xff] }
  0xeb   :  { %v417_v0 = vmul.f32 0.01, %v293_v58  ;;  %v464_v2 = vmax.f32 %v354_v49, %v432_v59  ;;  %v433_v3 = vmul.f32 0.01, %v357_v60  ;;  %v448_v10 = vmax.f32 %v290_v47, %v416_v57  ;;  %v81_v57 = vld [vmem:[%s2392_s2 + $0x58] sm:$0xff] }
  0xec   :  { %v451_v6 = vmax.f32 %v301_v52, %v419_v61  ;;  %v467_v8 = vmax.f32 %v365_v55, %v435_v63  ;;  %v79_v63 = vld [vmem:[%s2392_s2 + $0x48] sm:$0xff] }
  0xed   :  { %v449_v11 = vmax.f32 %v293_v58, %v417_v0  ;;  %v1723_v12 = vpop.f32.mrb[4].mxu0  ;;  %v465_v14 = vmax.f32 %v357_v60, %v433_v3  ;;  %v1739_v15 = vpop.f32.mrb[4].mxu1  ;;  %v97_v60 = vld [vmem:[%s2392_s2 + $0xd8] sm:$0xff]  ;;  %v95_v3 = vld [vmem:[%s2392_s2 + $0xc8] sm:$0xff] }
  0xee   :  { %v481_v17 = vpack.c.bf16 %v451_v6, %v450_v5  ;;  %v314_v18 = vadd.f32 %v1723_v12, %v76_v1  ;;  %v305_v19 = vpop.f32.mrb[5].mxu0  ;;  %v378_v21 = vadd.f32 %v1739_v15, %v92_v4  ;;  %v369_v22 = vpop.f32.mrb[5].mxu1  ;;  %v2101_v24 = vpack.c.bf16 %v467_v8, %v466_v62 }
  0xef   :  { %v306_v25 = vadd.f32 %v305_v19, %v74_v7  ;;  %v1724_v26 = vpop.f32.mrb[6].mxu0  ;;  %v480_v27 = vpack.c.bf16 %v449_v11, %v448_v10  ;;  %v370_v28 = vadd.f32 %v369_v22, %v90_v9  ;;  %v1740_v29 = vpop.f32.mrb[6].mxu1  ;;  %v2103_v30 = vpack.c.bf16 %v465_v14, %v464_v2 }
  0xf0   :  { %v422_v31 = vmul.f32 0.01, %v314_v18  ;;  %v317_v32 = vadd.f32 %v1724_v26, %v77_v13  ;;  %v308_v33 = vpop.f32.mrb[7].mxu0  ;;  %v438_v34 = vmul.f32 0.01, %v378_v21  ;;  %v381_v35 = vadd.f32 %v1740_v29, %v93_v16  ;;  %v372_v36 = vpop.f32.mrb[7].mxu1 }
  0xf1   :  { %v420_v37 = vmul.f32 0.01, %v306_v25  ;;  %v309_v38 = vadd.f32 %v308_v33, %v75_v20  ;;  %1765 = vmatprep.mubr.bf16.mxu1 %v480_v27  ;;  %v436_v39 = vmul.f32 0.01, %v370_v28  ;;  %v373_v40 = vadd.f32 %v372_v36, %v91_v23  ;;  %v84_v26 = vld [vmem:[%s2392_s2 + $0x70] sm:$0xff]  ;;  %v82_v33 = vld [vmem:[%s2392_s2 + $0x60] sm:$0xff] }
  0xf2   :  { %v423_v41 = vmul.f32 0.01, %v317_v32  ;;  %1766 = vmatmul.mubr.bf16.vlgmr.msra.gmra.mrb[16].mxu1 %v481_v17  ;;  %v470_v42 = vmax.f32 %v378_v21, %v438_v34  ;;  %v439_v43 = vmul.f32 0.01, %v381_v35  ;;  %v454_v49 = vmax.f32 %v314_v18, %v422_v31  ;;  %v100_v29 = vld [vmem:[%s2392_s2 + $0xf0] sm:$0xff] }
  0xf3   :  { %v421_v44 = vmul.f32 0.01, %v309_v38  ;;  %v468_v46 = vmax.f32 %v370_v28, %v436_v39  ;;  %v437_v47 = vmul.f32 0.01, %v373_v40  ;;  %v452_v54 = vmax.f32 %v306_v25, %v420_v37  ;;  %v85_v39 = vld [vmem:[%s2392_s2 + $0x78] sm:$0xff] }
  0xf4   :  { %v455_v50 = vmax.f32 %v317_v32, %v423_v41  ;;  %v471_v52 = vmax.f32 %v381_v35, %v439_v43  ;;  %v98_v35 = vld [vmem:[%s2392_s2 + $0xe0] sm:$0xff] }
  0xf5   :  { %v453_v55 = vmax.f32 %v309_v38, %v421_v44  ;;  %v1727_v56 = vpop.f32.mrb[8].mxu0  ;;  %v469_v58 = vmax.f32 %v373_v40, %v437_v47  ;;  %v1743_v59 = vpop.f32.mrb[8].mxu1 }
  0xf6   :  { %v330_v61 = vadd.f32 %v1727_v56, %v80_v45  ;;  %v321_v62 = vpop.f32.mrb[9].mxu0  ;;  %v483_v0 = vpack.c.bf16 %v455_v50, %v454_v49  ;;  %v394_v1 = vadd.f32 %v1743_v59, %v96_v48  ;;  %v385_v2 = vpop.f32.mrb[9].mxu1  ;;  %v2129_v4 = vpack.c.bf16 %v471_v52, %v470_v42  ;;  %v101_v42 = vld [vmem:[%s2392_s2 + $0xf8] sm:$0xff]  ;;  %v83_v45 = vld [vmem:[%s2392_s2 + $0x68] sm:$0xff] }
  0xf7   :  { %v322_v5 = vadd.f32 %v321_v62, %v78_v51  ;;  %v1728_v6 = vpop.f32.mrb[10].mxu0  ;;  %v482_v7 = vpack.c.bf16 %v453_v55, %v452_v54  ;;  %v386_v8 = vadd.f32 %v385_v2, %v94_v53  ;;  %v1744_v9 = vpop.f32.mrb[10].mxu1  ;;  %v2131_v10 = vpack.c.bf16 %v469_v58, %v468_v46  ;;  %v99_v49 = vld [vmem:[%s2392_s2 + $0xe8] sm:$0xff] }
  0xf8   :  { %v426_v11 = vmul.f32 0.01, %v330_v61  ;;  %v333_v12 = vadd.f32 %v1728_v6, %v81_v57  ;;  %v324_v13 = vpop.f32.mrb[11].mxu0  ;;  %v442_v14 = vmul.f32 0.01, %v394_v1  ;;  %v397_v15 = vadd.f32 %v1744_v9, %v97_v60  ;;  %v388_v16 = vpop.f32.mrb[11].mxu1 }
  0xf9   :  { %v424_v17 = vmul.f32 0.01, %v322_v5  ;;  %v325_v18 = vadd.f32 %v324_v13, %v79_v63  ;;  %1769 = vmatprep.mubr.bf16.mxu1 %v482_v7  ;;  %v440_v19 = vmul.f32 0.01, %v386_v8  ;;  %v389_v20 = vadd.f32 %v388_v16, %v95_v3 }
  0xfa   :  { %v427_v21 = vmul.f32 0.01, %v333_v12  ;;  %1770 = vmatmul.mubr.bf16.gmra.mrb[20].mxu1 %v483_v0  ;;  %v474_v22 = vmax.f32 %v394_v1, %v442_v14  ;;  %v443_v23 = vmul.f32 0.01, %v397_v15  ;;  %v458_v31 = vmax.f32 %v330_v61, %v426_v11 }
  0xfb   :  { %v425_v25 = vmul.f32 0.01, %v325_v18  ;;  %v472_v27 = vmax.f32 %v386_v8, %v440_v19  ;;  %v441_v28 = vmul.f32 0.01, %v389_v20  ;;  %v456_v36 = vmax.f32 %v322_v5, %v424_v17 }
  0xfc   :  { %v459_v32 = vmax.f32 %v333_v12, %v427_v21  ;;  %v475_v34 = vmax.f32 %v397_v15, %v443_v23  ;;  %v1889_v21 = vld [vmem:[%s2391_s6 + $0x28] sm:$0xff]   ;;  %v1043_v23 = vld [vmem:[%s2393_s1 + $0x18] sm:$0xff] }
  0xfd   :  { %v457_v37 = vmax.f32 %v325_v18, %v425_v25  ;;  %v1731_v38 = vpop.f32.mrb[12].mxu0  ;;  %v473_v40 = vmax.f32 %v389_v20, %v441_v28  ;;  %v1747_v41 = vpop.f32.mrb[12].mxu1  ;;  %1807 = vmatprep.subr.bf16.mxu0 %v1889_v21  ;;  %v1041_v25 = vld [vmem:[%s2393_s1 + $0x8] sm:$0xff]  ;;  %v1047_v28 = vld [vmem:[%s2393_s1 + $0x38] sm:$0xff] }
  0xfe   :  { %v346_v43 = vadd.f32 %v1731_v38, %v84_v26  ;;  %v337_v44 = vpop.f32.mrb[13].mxu0  ;;  %v485_v46 = vpack.c.bf16 %v459_v32, %v458_v31  ;;  %v410_v47 = vadd.f32 %v1747_v41, %v100_v29  ;;  %v401_v48 = vpop.f32.mrb[13].mxu1  ;;  %v493_v50 = vpack.c.bf16 %v475_v34, %v474_v22  ;;  %1808 = vmatpush3.bf16.msra.mxu0 %v1889_v21  ;;  %v1040_v22 = vld [vmem:[%s2393_s1] sm:$0xff]  ;;  %v1045_v26 = vld [vmem:[%s2393_s1 + $0x28] sm:$0xff]  ;;  %v1046_v29 = vld [vmem:[%s2393_s1 + $0x30] sm:$0xff] }
  0xff   :  { %v338_v51 = vadd.f32 %v337_v44, %v82_v33  ;;  %v1732_v52 = vpop.f32.mrb[14].mxu0  ;;  %v484_v53 = vpack.c.bf16 %v457_v37, %v456_v36  ;;  %v402_v54 = vadd.f32 %v401_v48, %v98_v35  ;;  %v1748_v55 = vpop.f32.mrb[14].mxu1  ;;  %v492_v56 = vpack.c.bf16 %v473_v40, %v472_v27  ;;  %v1044_v27 = vld [vmem:[%s2393_s1 + $0x20] sm:$0xff]  ;;  %v1049_v31 = vld [vmem:[%s2393_s1 + $0x48] sm:$0xff]  ;;  %v1051_v33 = vld [vmem:[%s2393_s1 + $0x58] sm:$0xff] }
 0x100   :  { %v430_v57 = vmul.f32 0.01, %v346_v43  ;;  %v349_v58 = vadd.f32 %v1732_v52, %v85_v39  ;;  %v340_v59 = vpop.f32.mrb[15].mxu0  ;;  %v446_v60 = vmul.f32 0.01, %v410_v47  ;;  %v413_v61 = vadd.f32 %v1748_v55, %v101_v42  ;;  %v404_v62 = vpop.f32.mrb[15].mxu1 }
 0x101   :  { %v428_v63 = vmul.f32 0.01, %v338_v51  ;;  %v341_v0 = vadd.f32 %v340_v59, %v83_v45  ;;  %1773 = vmatprep.mubr.bf16.mxu1 %v484_v53  ;;  %v444_v1 = vmul.f32 0.01, %v402_v54  ;;  %v405_v2 = vadd.f32 %v404_v62, %v99_v49  ;;  %v1048_v32 = vld [vmem:[%s2393_s1 + $0x40] sm:$0xff]  ;;  %v1050_v34 = vld [vmem:[%s2393_s1 + $0x50] sm:$0xff] }
 0x102   :  { %v431_v3 = vmul.f32 0.01, %v349_v58  ;;  %1774 = vmatmul.mubr.bf16.gmra.mrb[24].mxu1 %v485_v46  ;;  %v478_v5 = vmax.f32 %v410_v47, %v446_v60  ;;  %v447_v6 = vmul.f32 0.01, %v413_v61  ;;  %v462_v11 = vmax.f32 %v346_v43, %v430_v57  ;;  %v1053_v35 = vld [vmem:[%s2393_s1 + $0x68] sm:$0xff]  ;;  %v1052_v36 = vld [vmem:[%s2393_s1 + $0x60] sm:$0xff] }
 0x103   :  { %v429_v7 = vmul.f32 0.01, %v341_v0  ;;  %v476_v8 = vmax.f32 %v402_v54, %v444_v1  ;;  %v445_v9 = vmul.f32 0.01, %v405_v2  ;;  %v460_v14 = vmax.f32 %v338_v51, %v428_v63  ;;  %v1055_v37 = vld [vmem:[%s2393_s1 + $0x78] sm:$0xff]  ;;  %v1054_v38 = vld [vmem:[%s2393_s1 + $0x70] sm:$0xff] }
 0x104   :  { %v463_v12 = vmax.f32 %v349_v58, %v431_v3  ;;  %v479_v13 = vmax.f32 %v413_v61, %v447_v6  ;;  %v1057_v39 = vld [vmem:[%s2393_s1 + $0x88] sm:$0xff]  ;;  %v1056_v40 = vld [vmem:[%s2393_s1 + $0x80] sm:$0xff]  ;;  %v1059_v41 = vld [vmem:[%s2393_s1 + $0x98] sm:$0xff] }
 0x105   :  { %v461_v15 = vmax.f32 %v341_v0, %v429_v7  ;;  %v477_v16 = vmax.f32 %v405_v2, %v445_v9  ;;  %v1058_v42 = vld [vmem:[%s2393_s1 + $0x90] sm:$0xff]  ;;  %v1061_v43 = vld [vmem:[%s2393_s1 + $0xa8] sm:$0xff]  ;;  %v1060_v44 = vld [vmem:[%s2393_s1 + $0xa0] sm:$0xff] }
 0x106   :  { %v487_v17 = vpack.c.bf16 %v463_v12, %v462_v11  ;;  %v495_v18 = vpack.c.bf16 %v479_v13, %v478_v5  ;;  %v1063_v45 = vld [vmem:[%s2393_s1 + $0xb8] sm:$0xff]  ;;  %v1062_v46 = vld [vmem:[%s2393_s1 + $0xb0] sm:$0xff]  ;;  %v1065_v47 = vld [vmem:[%s2393_s1 + $0xc8] sm:$0xff] }
 0x107   :  { %v486_v19 = vpack.c.bf16 %v461_v15, %v460_v14  ;;  %v494_v20 = vpack.c.bf16 %v477_v16, %v476_v8  ;;  %v1064_v48 = vld [vmem:[%s2393_s1 + $0xc0] sm:$0xff]  ;;  %v1067_v49 = vld [vmem:[%s2393_s1 + $0xd8] sm:$0xff]  ;;  %v1069_v51 = vld [vmem:[%s2393_s1 + $0xe8] sm:$0xff] }
 0x108   :  { %v1068_v52 = vld [vmem:[%s2393_s1 + $0xe0] sm:$0xff]  ;;  %v1071_v53 = vld [vmem:[%s2393_s1 + $0xf8] sm:$0xff]  ;;  %v1070_v54 = vld [vmem:[%s2393_s1 + $0xf0] sm:$0xff] }
 0x109   :  { %1777 = vmatprep.mubr.bf16.mxu1 %v486_v19  ;;  %v2269_v55 = vld [vmem:[%s2394_s5] ss:$0 sm:$0xff] }
 0x10a   :  { %1778 = vmatmul.mubr.bf16.gmra.mrb[28].mxu1 %v487_v17 }
 0x10b   :  { %1781 = vmatprep.mubr.bf16.mxu1 %v2103_v30  ;;  %v1890_v30 = vld [vmem:[%s2391_s6 + $0x30] sm:$0xff]  }
 0x10c   :  { %1809 = vmatprep.subr.bf16.mxu0 %v1890_v30 }
 0x10d   :  { %1810 = vmatpush3.bf16.msra.mxu0 %v1890_v30 }
 0x112   :  { %1782 = vmatmul.mubr.bf16.gmra.mrb[32].mxu1 %v2101_v24  ;;  %v1891_v24 = vld [vmem:[%s2391_s6 + $0x38] sm:$0xff]  }
 0x113   :  { %1785 = vmatprep.mubr.bf16.mxu1 %v2131_v10  ;;  %1811 = vmatprep.subr.bf16.mxu0 %v1891_v24  ;;  %v1042_v10 = vld [vmem:[%s2393_s1 + $0x10] sm:$0xff] }
 0x114   :  { %1812 = vmatpush3.bf16.msra.mxu0 %v1891_v24 }
 0x11a   :  { %1786 = vmatmul.mubr.bf16.gmra.mrb[36].mxu1 %v2129_v4  ;;  %v1892_v4 = vmov 0  }
 0x11b   :  { %1789 = vmatprep.mubr.bf16.mxu1 %v492_v56  ;;  %1855 = vset.pattern.permute.xlu1 %v1892_v4 }
 0x11c   :  { %1854 = vset.pattern.permute.xlu0 %v1892_v4  ;;  %1084 = vperm.xlu1 %1855, %v1042_v10  }
 0x11d   :  { %1074 = vperm.xlu0 %1854, %v1040_v22  }
 0x120   :  { %1089 = vperm.xlu1 %1855, %v1043_v23  }
 0x121   :  { %1079 = vperm.xlu0 %1854, %v1041_v25  }
 0x122   :  { %1790 = vmatmul.mubr.bf16.gmra.mrb[40].mxu1 %v493_v50  ;;  %v1066_v50 = vld [vmem:[%s2393_s1 + $0xd0] sm:$0xff] }
 0x123   :  { %1793 = vmatprep.mubr.bf16.mxu1 %v494_v20 }
 0x124   :  { %1099 = vperm.xlu1 %1855, %v1045_v26  }
 0x125   :  { %1094 = vperm.xlu0 %1854, %v1044_v27  }
 0x128   :  { %1109 = vperm.xlu1 %1855, %v1047_v28  }
 0x129   :  { %1104 = vperm.xlu0 %1854, %v1046_v29  }
 0x12a   :  { %1794 = vmatmul.mubr.bf16.gmra.mrb[44].mxu1 %v495_v18 }
 0x12c   :  { %1119 = vperm.xlu1 %1855, %v1049_v31  }
 0x12d   :  { %1114 = vperm.xlu0 %1854, %v1048_v32  }
 0x130   :  { %1129 = vperm.xlu1 %1855, %v1051_v33  }
 0x131   :  { %1124 = vperm.xlu0 %1854, %v1050_v34  }
 0x134   :  { %1139 = vperm.xlu1 %1855, %v1053_v35  }
 0x135   :  { %1134 = vperm.xlu0 %1854, %v1052_v36  }
 0x138   :  { %1149 = vperm.xlu1 %1855, %v1055_v37  }
 0x139   :  { %1144 = vperm.xlu0 %1854, %v1054_v38  }
 0x13c   :  { %1159 = vperm.xlu1 %1855, %v1057_v39  }
 0x13d   :  { %1154 = vperm.xlu0 %1854, %v1056_v40  }
 0x140   :  { %1169 = vperm.xlu1 %1855, %v1059_v41  }
 0x141   :  { %1164 = vperm.xlu0 %1854, %v1058_v42  }
 0x144   :  { %1179 = vperm.xlu1 %1855, %v1061_v43  }
 0x145   :  { %1174 = vperm.xlu0 %1854, %v1060_v44  }
 0x148   :  { %1189 = vperm.xlu1 %1855, %v1063_v45  }
 0x149   :  { %1184 = vperm.xlu0 %1854, %v1062_v46  }
 0x14c   :  { %1199 = vperm.xlu1 %1855, %v1065_v47  }
 0x14d   :  { %1194 = vperm.xlu0 %1854, %v1064_v48  }
 0x150   :  { %1209 = vperm.xlu1 %1855, %v1067_v49  }
 0x151   :  { %1204 = vperm.xlu0 %1854, %v1066_v50  }
 0x154   :  { %1219 = vperm.xlu1 %1855, %v1069_v51  }
 0x155   :  { %1214 = vperm.xlu0 %1854, %v1068_v52  }
 0x158   :  { %1229 = vperm.xlu1 %1855, %v1071_v53  }
 0x159   :  { %1224 = vperm.xlu0 %1854, %v1070_v54  }
 0x1c5   :  { %v1767_v56 = vpop.f32.mrb[16].mxu1 }
 0x1c6   :  { %v610_v57 = vadd.f32 %v1767_v56, %v2269_v55  ;;  %v601_v58 = vpop.f32.mrb[17].mxu1 }
 0x1c7   :  { %v602_v59 = vadd.f32 %v2269_v55, %v601_v58  ;;  %v1768_v60 = vpop.f32.mrb[18].mxu1 }
 0x1c8   :  { %v730_v61 = vmul.f32 0.01, %v610_v57  ;;  %v613_v62 = vadd.f32 %v1768_v60, %v2269_v55  ;;  %v604_v63 = vpop.f32.mrb[19].mxu1 }
 0x1c9   :  { %v728_v0 = vmul.f32 0.01, %v602_v59  ;;  %v605_v1 = vadd.f32 %v2269_v55, %v604_v63 }
 0x1ca   :  { %v731_v2 = vmul.f32 0.01, %v613_v62  ;;  %v762_v5 = vmax.f32 %v610_v57, %v730_v61 }
 0x1cb   :  { %v729_v3 = vmul.f32 0.01, %v605_v1  ;;  %v760_v7 = vmax.f32 %v602_v59, %v728_v0 }
 0x1cc   :  { %v763_v6 = vmax.f32 %v613_v62, %v731_v2 }
 0x1cd   :  { %v761_v8 = vmax.f32 %v605_v1, %v729_v3  ;;  %v1771_v9 = vpop.f32.mrb[20].mxu1 }
 0x1ce   :  { %v793_v11 = vpack.c.bf16 %v763_v6, %v762_v5  ;;  %v626_v12 = vadd.f32 %v1771_v9, %v2269_v55  ;;  %v617_v13 = vpop.f32.mrb[21].mxu1 }
 0x1cf   :  { %v618_v14 = vadd.f32 %v2269_v55, %v617_v13  ;;  %v1772_v15 = vpop.f32.mrb[22].mxu1  ;;  %v792_v16 = vpack.c.bf16 %v761_v8, %v760_v7 }
 0x1d0   :  { %v734_v17 = vmul.f32 0.01, %v626_v12  ;;  %v629_v18 = vadd.f32 %v1772_v15, %v2269_v55  ;;  %v620_v19 = vpop.f32.mrb[23].mxu1 }
 0x1d1   :  { %v732_v20 = vmul.f32 0.01, %v618_v14  ;;  %v621_v21 = vadd.f32 %v2269_v55, %v620_v19  ;;  %1813 = vmatprep.mubr.bf16.mxu0 %v792_v16 }
 0x1d2   :  { %v735_v30 = vmul.f32 0.01, %v629_v18  ;;  %1814 = vmatmul.mubr.bf16.vlgmr.msra.gmra.mrb[16].mxu0 %v793_v11  ;;  %v766_v4 = vmax.f32 %v626_v12, %v734_v17 }
 0x1d3   :  { %v733_v24 = vmul.f32 0.01, %v621_v21  ;;  %v764_v22 = vmax.f32 %v618_v14, %v732_v20 }
 0x1d4   :  { %v767_v10 = vmax.f32 %v629_v18, %v735_v30 }
 0x1d5   :  { %v765_v23 = vmax.f32 %v621_v21, %v733_v24  ;;  %v1775_v25 = vpop.f32.mrb[24].mxu1 }
 0x1d6   :  { %v642_v26 = vadd.f32 %v1775_v25, %v2269_v55  ;;  %v633_v27 = vpop.f32.mrb[25].mxu1  ;;  %v795_v28 = vpack.c.bf16 %v767_v10, %v766_v4 }
 0x1d7   :  { %v634_v29 = vadd.f32 %v2269_v55, %v633_v27  ;;  %v1776_v31 = vpop.f32.mrb[26].mxu1  ;;  %v794_v32 = vpack.c.bf16 %v765_v23, %v764_v22 }
 0x1d8   :  { %v738_v33 = vmul.f32 0.01, %v642_v26  ;;  %v645_v34 = vadd.f32 %v1776_v31, %v2269_v55  ;;  %v636_v35 = vpop.f32.mrb[27].mxu1 }
 0x1d9   :  { %v736_v36 = vmul.f32 0.01, %v634_v29  ;;  %v637_v37 = vadd.f32 %v2269_v55, %v636_v35  ;;  %1817 = vmatprep.mubr.bf16.mxu0 %v794_v32 }
 0x1da   :  { %v739_v38 = vmul.f32 0.01, %v645_v34  ;;  %1818 = vmatmul.mubr.bf16.gmra.mrb[20].mxu0 %v795_v28  ;;  %v770_v40 = vmax.f32 %v642_v26, %v738_v33 }
 0x1db   :  { %v737_v39 = vmul.f32 0.01, %v637_v37  ;;  %v768_v42 = vmax.f32 %v634_v29, %v736_v36 }
 0x1dc   :  { %v771_v41 = vmax.f32 %v645_v34, %v739_v38 }
 0x1dd   :  { %v769_v43 = vmax.f32 %v637_v37, %v737_v39  ;;  %v1779_v44 = vpop.f32.mrb[28].mxu1 }
 0x1de   :  { %v658_v45 = vadd.f32 %v1779_v44, %v2269_v55  ;;  %v649_v46 = vpop.f32.mrb[29].mxu1  ;;  %v797_v47 = vpack.c.bf16 %v771_v41, %v770_v40 }
 0x1df   :  { %v650_v48 = vadd.f32 %v2269_v55, %v649_v46  ;;  %v1780_v49 = vpop.f32.mrb[30].mxu1  ;;  %v796_v50 = vpack.c.bf16 %v769_v43, %v768_v42 }
 0x1e0   :  { %v742_v51 = vmul.f32 0.01, %v658_v45  ;;  %v661_v52 = vadd.f32 %v1780_v49, %v2269_v55  ;;  %v652_v53 = vpop.f32.mrb[31].mxu1 }
 0x1e1   :  { %v740_v54 = vmul.f32 0.01, %v650_v48  ;;  %v653_v56 = vadd.f32 %v2269_v55, %v652_v53  ;;  %1821 = vmatprep.mubr.bf16.mxu0 %v796_v50 }
 0x1e2   :  { %v743_v57 = vmul.f32 0.01, %v661_v52  ;;  %1822 = vmatmul.mubr.bf16.gmra.mrb[24].mxu0 %v797_v47  ;;  %v774_v59 = vmax.f32 %v658_v45, %v742_v51 }
 0x1e3   :  { %v741_v58 = vmul.f32 0.01, %v653_v56  ;;  %v772_v61 = vmax.f32 %v650_v48, %v740_v54 }
 0x1e4   :  { %v775_v60 = vmax.f32 %v661_v52, %v743_v57 }
 0x1e5   :  { %v773_v62 = vmax.f32 %v653_v56, %v741_v58  ;;  %v1783_v63 = vpop.f32.mrb[32].mxu1 }
 0x1e6   :  { %v674_v0 = vadd.f32 %v1783_v63, %v2269_v55  ;;  %v665_v1 = vpop.f32.mrb[33].mxu1  ;;  %v799_v2 = vpack.c.bf16 %v775_v60, %v774_v59 }
 0x1e7   :  { %v666_v3 = vadd.f32 %v2269_v55, %v665_v1  ;;  %v1784_v5 = vpop.f32.mrb[34].mxu1  ;;  %v798_v6 = vpack.c.bf16 %v773_v62, %v772_v61 }
 0x1e8   :  { %v746_v7 = vmul.f32 0.01, %v674_v0  ;;  %v677_v8 = vadd.f32 %v1784_v5, %v2269_v55  ;;  %v668_v9 = vpop.f32.mrb[35].mxu1 }
 0x1e9   :  { %v744_v11 = vmul.f32 0.01, %v666_v3  ;;  %v669_v12 = vadd.f32 %v2269_v55, %v668_v9  ;;  %1825 = vmatprep.mubr.bf16.mxu0 %v798_v6 }
 0x1ea   :  { %v747_v13 = vmul.f32 0.01, %v677_v8  ;;  %1826 = vmatmul.mubr.bf16.gmra.mrb[28].mxu0 %v799_v2  ;;  %v778_v15 = vmax.f32 %v674_v0, %v746_v7 }
 0x1eb   :  { %v745_v14 = vmul.f32 0.01, %v669_v12  ;;  %v776_v17 = vmax.f32 %v666_v3, %v744_v11 }
 0x1ec   :  { %v779_v16 = vmax.f32 %v677_v8, %v747_v13  ;;  %v1075_v13 = vpop.permute.xlu0 %1074 }
 0x1ed   :  { %v777_v18 = vmax.f32 %v669_v12, %v745_v14  ;;  %v1787_v19 = vpop.f32.mrb[36].mxu1  ;;  %v1085_v12 = vpop.permute.xlu1 %1084 }
 0x1ee   :  { %v690_v20 = vadd.f32 %v1787_v19, %v2269_v55  ;;  %v681_v21 = vpop.f32.mrb[37].mxu1  ;;  %v801_v30 = vpack.c.bf16 %v779_v16, %v778_v15 }
 0x1ef   :  { %v682_v24 = vadd.f32 %v2269_v55, %v681_v21  ;;  %v1788_v4 = vpop.f32.mrb[38].mxu1  ;;  %v800_v10 = vpack.c.bf16 %v777_v18, %v776_v17  ;;  %v2306_v21 = vld [vmem:[%s2395_s7] ss:$0 sm:$0xff] }
 0x1f0   :  { %v750_v22 = vmul.f32 0.01, %v690_v20  ;;  %v693_v23 = vadd.f32 %v1788_v4, %v2269_v55  ;;  %v684_v25 = vpop.f32.mrb[39].mxu1  ;;  %v1080_v15 = vpop.permute.xlu0 %1079 }
 0x1f1   :  { %v748_v26 = vmul.f32 0.01, %v682_v24  ;;  %v685_v27 = vadd.f32 %v2269_v55, %v684_v25  ;;  %1829 = vmatprep.mubr.bf16.mxu0 %v800_v10  ;;  %v1090_v14 = vpop.permute.xlu1 %1089 }
 0x1f2   :  { %v751_v28 = vmul.f32 0.01, %v693_v23  ;;  %1830 = vmatmul.mubr.bf16.gmra.mrb[32].mxu0 %v801_v30  ;;  %v782_v31 = vmax.f32 %v690_v20, %v750_v22 }
 0x1f3   :  { %v749_v29 = vmul.f32 0.01, %v685_v27  ;;  %v780_v33 = vmax.f32 %v682_v24, %v748_v26 }
 0x1f4   :  { %v783_v32 = vmax.f32 %v693_v23, %v751_v28  ;;  %v1095_v17 = vpop.permute.xlu0 %1094 }
 0x1f5   :  { %v781_v34 = vmax.f32 %v685_v27, %v749_v29  ;;  %v1791_v35 = vpop.f32.mrb[40].mxu1  ;;  %v1100_v16 = vpop.permute.xlu1 %1099 }
 0x1f6   :  { %v706_v36 = vadd.f32 %v1791_v35, %v2269_v55  ;;  %v697_v37 = vpop.f32.mrb[41].mxu1  ;;  %v803_v38 = vpack.c.bf16 %v783_v32, %v782_v31 }
 0x1f7   :  { %v698_v39 = vadd.f32 %v2269_v55, %v697_v37  ;;  %v1792_v40 = vpop.f32.mrb[42].mxu1  ;;  %v802_v41 = vpack.c.bf16 %v781_v34, %v780_v33 }
 0x1f8   :  { %v754_v42 = vmul.f32 0.01, %v706_v36  ;;  %v709_v43 = vadd.f32 %v1792_v40, %v2269_v55  ;;  %v700_v44 = vpop.f32.mrb[43].mxu1 }
 0x1f9   :  { %v752_v45 = vmul.f32 0.01, %v698_v39  ;;  %v701_v46 = vadd.f32 %v2269_v55, %v700_v44  ;;  %1833 = vmatprep.mubr.bf16.mxu0 %v802_v41  ;;  %v1110_v18 = vpop.permute.xlu1 %1109 }
 0x1fa   :  { %v755_v47 = vmul.f32 0.01, %v709_v43  ;;  %1834 = vmatmul.mubr.bf16.gmra.mrb[36].mxu0 %v803_v38  ;;  %v786_v49 = vmax.f32 %v706_v36, %v754_v42 }
 0x1fb   :  { %v753_v48 = vmul.f32 0.01, %v701_v46  ;;  %v784_v51 = vmax.f32 %v698_v39, %v752_v45 }
 0x1fc   :  { %v787_v50 = vmax.f32 %v709_v43, %v755_v47 }
 0x1fd   :  { %v785_v52 = vmax.f32 %v701_v46, %v753_v48  ;;  %v1795_v53 = vpop.f32.mrb[44].mxu1  ;;  %v1120_v19 = vpop.permute.xlu1 %1119 }
 0x1fe   :  { %v722_v54 = vadd.f32 %v1795_v53, %v2269_v55  ;;  %v713_v56 = vpop.f32.mrb[45].mxu1  ;;  %v805_v57 = vpack.c.bf16 %v787_v50, %v786_v49 }
 0x1ff   :  { %v714_v58 = vadd.f32 %v2269_v55, %v713_v56  ;;  %v1796_v59 = vpop.f32.mrb[46].mxu1  ;;  %v804_v60 = vpack.c.bf16 %v785_v52, %v784_v51 }
 0x200   :  { %v758_v61 = vmul.f32 0.01, %v722_v54  ;;  %v725_v62 = vadd.f32 %v1796_v59, %v2269_v55  ;;  %v716_v63 = vpop.f32.mrb[47].mxu1 }
 0x201   :  { %v756_v0 = vmul.f32 0.01, %v714_v58  ;;  %v717_v1 = vadd.f32 %v2269_v55, %v716_v63  ;;  %1837 = vmatprep.mubr.bf16.mxu0 %v804_v60  ;;  %v1105_v55 = vpop.permute.xlu0 %1104  ;;  %v1130_v30 = vpop.permute.xlu1 %1129 }
 0x202   :  { %v759_v2 = vmul.f32 0.01, %v725_v62  ;;  %1838 = vmatmul.mubr.bf16.gmra.mrb[40].mxu0 %v805_v57  ;;  %v790_v5 = vmax.f32 %v722_v54, %v758_v61 }
 0x203   :  { %v757_v3 = vmul.f32 0.01, %v717_v1  ;;  %v788_v7 = vmax.f32 %v714_v58, %v756_v0 }
 0x204   :  { %v791_v6 = vmax.f32 %v725_v62, %v759_v2 }
 0x205   :  { %v789_v8 = vmax.f32 %v717_v1, %v757_v3  ;;  %v1115_v20 = vpop.permute.xlu0 %1114  ;;  %v1140_v29 = vpop.permute.xlu1 %1139 }
 0x206   :  { %v807_v9 = vpack.c.bf16 %v791_v6, %v790_v5 }
 0x207   :  { %v806_v11 = vpack.c.bf16 %v789_v8, %v788_v7 }
 0x209   :  { %1841 = vmatprep.mubr.bf16.mxu0 %v806_v11  ;;  %v1125_v24 = vpop.permute.xlu0 %1124  ;;  %v1150_v43 = vpop.permute.xlu1 %1149 }
 0x20a   :  { %1842 = vmatmul.mubr.bf16.gmra.mrb[44].mxu0 %v807_v9 }
 0x20d   :  { %v1135_v33 = vpop.permute.xlu0 %1134  ;;  %v1160_v56 = vpop.permute.xlu1 %1159 }
 0x211   :  { %v1145_v46 = vpop.permute.xlu0 %1144  ;;  %v1170_v6 = vpop.permute.xlu1 %1169 }
 0x215   :  { %v1155_v59 = vpop.permute.xlu0 %1154 }
 0x219   :  { %v1165_v8 = vpop.permute.xlu0 %1164 }
 0x2a5   :  { %v1815_v4 = vpop.f32.mrb[16].mxu0 }
 0x2a6   :  { %v922_v10 = vadd.f32 %v1815_v4, %v2306_v21  ;;  %v913_v22 = vpop.f32.mrb[17].mxu0 }
 0x2a7   :  { %v914_v23 = vadd.f32 %v2306_v21, %v913_v22  ;;  %v1816_v25 = vpop.f32.mrb[18].mxu0 }
 0x2a8   :  { %v925_v26 = vadd.f32 %v1816_v25, %v2306_v21  ;;  %v916_v27 = vpop.f32.mrb[19].mxu0  ;;  %v1234_v31 = vmul.f32 %v1085_v12, %v922_v10 }
 0x2a9   :  { %v917_v28 = vadd.f32 %v2306_v21, %v916_v27  ;;  %v1232_v34 = vmul.f32 %v1075_v13, %v914_v23 }
 0x2aa   :  { %v1235_v32 = vmul.f32 %v1090_v14, %v925_v26 }
 0x2ab   :  { %v1233_v35 = vmul.f32 %v1080_v15, %v917_v28 }
 0x2ac   :  { %v1554_v36 = vpack.c.bf16 %v1235_v32, %v1234_v31 }
 0x2ad   :  { %v1549_v37 = vpack.c.bf16 %v1233_v35, %v1232_v34  ;;  %v1819_v38 = vpop.f32.mrb[20].mxu0 }
 0x2ae   :  { %1626 = vst [vmem:[%s2396_s8 + $0x8] sm:$0xff] %v1554_v36   ;;  %v938_v39 = vadd.f32 %v1819_v38, %v2306_v21  ;;  %v929_v40 = vpop.f32.mrb[21].mxu0 }
 0x2af   :  { %1550 = vst [vmem:[%s2396_s8] sm:$0xff] %v1549_v37   ;;  %v930_v41 = vadd.f32 %v2306_v21, %v929_v40  ;;  %v1820_v42 = vpop.f32.mrb[22].mxu0 }
 0x2b0   :  { %v941_v44 = vadd.f32 %v1820_v42, %v2306_v21  ;;  %v932_v45 = vpop.f32.mrb[23].mxu0  ;;  %v1238_v48 = vmul.f32 %v1105_v55, %v938_v39  ;;  %v1180_v55 = vpop.permute.xlu1 %1179 }
 0x2b1   :  { %v933_v47 = vadd.f32 %v2306_v21, %v932_v45  ;;  %v1236_v50 = vmul.f32 %v1095_v17, %v930_v41 }
 0x2b2   :  { %v1239_v49 = vmul.f32 %v1110_v18, %v941_v44 }
 0x2b3   :  { %v1237_v51 = vmul.f32 %v1100_v16, %v933_v47 }
 0x2b4   :  { %v1564_v52 = vpack.c.bf16 %v1239_v49, %v1238_v48  ;;  %v1190_v31 = vpop.permute.xlu1 %1189 }
 0x2b5   :  { %v1559_v53 = vpack.c.bf16 %v1237_v51, %v1236_v50  ;;  %v1823_v54 = vpop.f32.mrb[24].mxu0 }
 0x2b6   :  { %1628 = vst [vmem:[%s2396_s8 + $0x18] sm:$0xff] %v1564_v52   ;;  %v954_v57 = vadd.f32 %v1823_v54, %v2306_v21  ;;  %v945_v58 = vpop.f32.mrb[25].mxu0 }
 0x2b7   :  { %1627 = vst [vmem:[%s2396_s8 + $0x10] sm:$0xff] %v1559_v53   ;;  %v946_v60 = vadd.f32 %v2306_v21, %v945_v58  ;;  %v1824_v61 = vpop.f32.mrb[26].mxu0 }
 0x2b8   :  { %v957_v62 = vadd.f32 %v1824_v61, %v2306_v21  ;;  %v948_v63 = vpop.f32.mrb[27].mxu0  ;;  %v1242_v1 = vmul.f32 %v1125_v24, %v954_v57  ;;  %v1200_v42 = vpop.permute.xlu1 %1199 }
 0x2b9   :  { %v949_v0 = vadd.f32 %v2306_v21, %v948_v63  ;;  %v1240_v3 = vmul.f32 %v1115_v20, %v946_v60 }
 0x2ba   :  { %v1243_v2 = vmul.f32 %v1130_v30, %v957_v62  ;;  %v1175_v30 = vpop.permute.xlu0 %1174 }
 0x2bb   :  { %v1241_v5 = vmul.f32 %v1120_v19, %v949_v0 }
 0x2bc   :  { %v1574_v7 = vpack.c.bf16 %v1243_v2, %v1242_v1 }
 0x2bd   :  { %v1569_v9 = vpack.c.bf16 %v1241_v5, %v1240_v3  ;;  %v1827_v11 = vpop.f32.mrb[28].mxu0 }
 0x2be   :  { %1630 = vst [vmem:[%s2396_s8 + $0x28] sm:$0xff] %v1574_v7   ;;  %v970_v12 = vadd.f32 %v1827_v11, %v2306_v21  ;;  %v961_v13 = vpop.f32.mrb[29].mxu0 }
 0x2bf   :  { %1629 = vst [vmem:[%s2396_s8 + $0x20] sm:$0xff] %v1569_v9   ;;  %v962_v14 = vadd.f32 %v2306_v21, %v961_v13  ;;  %v1828_v15 = vpop.f32.mrb[30].mxu0 }
 0x2c0   :  { %v973_v16 = vadd.f32 %v1828_v15, %v2306_v21  ;;  %v964_v17 = vpop.f32.mrb[31].mxu0  ;;  %v1246_v19 = vmul.f32 %v1145_v46, %v970_v12 }
 0x2c1   :  { %v965_v18 = vadd.f32 %v2306_v21, %v964_v17  ;;  %v1244_v24 = vmul.f32 %v1135_v33, %v962_v14  ;;  %v1185_v33 = vpop.permute.xlu0 %1184 }
 0x2c2   :  { %v1247_v20 = vmul.f32 %v1150_v43, %v973_v16 }
 0x2c3   :  { %v1245_v4 = vmul.f32 %v1140_v29, %v965_v18 }
 0x2c4   :  { %v1584_v10 = vpack.c.bf16 %v1247_v20, %v1246_v19 }
 0x2c5   :  { %v1579_v22 = vpack.c.bf16 %v1245_v4, %v1244_v24  ;;  %v1831_v23 = vpop.f32.mrb[32].mxu0  ;;  %v1195_v45 = vpop.permute.xlu0 %1194 }
 0x2c6   :  { %1632 = vst [vmem:[%s2396_s8 + $0x38] sm:$0xff] %v1584_v10   ;;  %v986_v25 = vadd.f32 %v1831_v23, %v2306_v21  ;;  %v977_v26 = vpop.f32.mrb[33].mxu0 }
 0x2c7   :  { %1631 = vst [vmem:[%s2396_s8 + $0x30] sm:$0xff] %v1579_v22   ;;  %v978_v27 = vadd.f32 %v2306_v21, %v977_v26  ;;  %v1832_v28 = vpop.f32.mrb[34].mxu0 }
 0x2c8   :  { %v989_v29 = vadd.f32 %v1832_v28, %v2306_v21  ;;  %v980_v32 = vpop.f32.mrb[35].mxu0  ;;  %v1250_v35 = vmul.f32 %v1165_v8, %v986_v25 }
 0x2c9   :  { %v981_v34 = vadd.f32 %v2306_v21, %v980_v32  ;;  %v1248_v37 = vmul.f32 %v1155_v59, %v978_v27  ;;  %v1205_v58 = vpop.permute.xlu0 %1204 }
 0x2ca   :  { %v1251_v36 = vmul.f32 %v1170_v6, %v989_v29 }
 0x2cb   :  { %v1249_v38 = vmul.f32 %v1160_v56, %v981_v34  ;;  %v1210_v56 = vpop.permute.xlu1 %1209 }
 0x2cc   :  { %v1594_v39 = vpack.c.bf16 %v1251_v36, %v1250_v35 }
 0x2cd   :  { %v1589_v40 = vpack.c.bf16 %v1249_v38, %v1248_v37  ;;  %v1835_v41 = vpop.f32.mrb[36].mxu0  ;;  %v1215_v8 = vpop.permute.xlu0 %1214 }
 0x2ce   :  { %1634 = vst [vmem:[%s2396_s8 + $0x48] sm:$0xff] %v1594_v39   ;;  %v1002_v43 = vadd.f32 %v1835_v41, %v2306_v21  ;;  %v993_v44 = vpop.f32.mrb[37].mxu0 }
 0x2cf   :  { %1633 = vst [vmem:[%s2396_s8 + $0x40] sm:$0xff] %v1589_v40   ;;  %v994_v46 = vadd.f32 %v2306_v21, %v993_v44  ;;  %v1836_v47 = vpop.f32.mrb[38].mxu0  ;;  %v1220_v7 = vpop.permute.xlu1 %1219 }
 0x2d0   :  { %v1005_v48 = vadd.f32 %v1836_v47, %v2306_v21  ;;  %v996_v49 = vpop.f32.mrb[39].mxu0  ;;  %v1254_v51 = vmul.f32 %v1185_v33, %v1002_v43 }
 0x2d1   :  { %v997_v50 = vadd.f32 %v2306_v21, %v996_v49  ;;  %v1252_v53 = vmul.f32 %v1175_v30, %v994_v46  ;;  %v1225_v30 = vpop.permute.xlu0 %1224 }
 0x2d2   :  { %v1255_v52 = vmul.f32 %v1190_v31, %v1005_v48 }
 0x2d3   :  { %v1253_v54 = vmul.f32 %v1180_v55, %v997_v50  ;;  %v1230_v20 = vpop.permute.xlu1 %1229 }
 0x2d4   :  { %v1604_v57 = vpack.c.bf16 %v1255_v52, %v1254_v51 }
 0x2d5   :  { %v1599_v59 = vpack.c.bf16 %v1253_v54, %v1252_v53  ;;  %v1839_v60 = vpop.f32.mrb[40].mxu0 }
 0x2d6   :  { %1636 = vst [vmem:[%s2396_s8 + $0x58] sm:$0xff] %v1604_v57   ;;  %v1018_v61 = vadd.f32 %v1839_v60, %v2306_v21  ;;  %v1009_v62 = vpop.f32.mrb[41].mxu0 }
 0x2d7   :  { %1635 = vst [vmem:[%s2396_s8 + $0x50] sm:$0xff] %v1599_v59   ;;  %v1010_v63 = vadd.f32 %v2306_v21, %v1009_v62  ;;  %v1840_v0 = vpop.f32.mrb[42].mxu0 }
 0x2d8   :  { %v1021_v1 = vadd.f32 %v1840_v0, %v2306_v21  ;;  %v1012_v2 = vpop.f32.mrb[43].mxu0  ;;  %v1258_v5 = vmul.f32 %v1205_v58, %v1018_v61 }
 0x2d9   :  { %v1013_v3 = vadd.f32 %v2306_v21, %v1012_v2  ;;  %v1256_v9 = vmul.f32 %v1195_v45, %v1010_v63 }
 0x2da   :  { %v1259_v6 = vmul.f32 %v1210_v56, %v1021_v1 }
 0x2db   :  { %v1257_v11 = vmul.f32 %v1200_v42, %v1013_v3 }
 0x2dc   :  { %v1614_v12 = vpack.c.bf16 %v1259_v6, %v1258_v5 }
 0x2dd   :  { %v1609_v13 = vpack.c.bf16 %v1257_v11, %v1256_v9  ;;  %v1843_v14 = vpop.f32.mrb[44].mxu0 }
 0x2de   :  { %1638 = vst [vmem:[%s2396_s8 + $0x68] sm:$0xff] %v1614_v12   ;;  %v1034_v15 = vadd.f32 %v1843_v14, %v2306_v21  ;;  %v1025_v16 = vpop.f32.mrb[45].mxu0 }
 0x2df   :  { %1637 = vst [vmem:[%s2396_s8 + $0x60] sm:$0xff] %v1609_v13   ;;  %v1026_v17 = vadd.f32 %v2306_v21, %v1025_v16  ;;  %v1844_v18 = vpop.f32.mrb[46].mxu0 }
 0x2e0   :  { %v1037_v55 = vadd.f32 %v1844_v18, %v2306_v21  ;;  %v1028_v19 = vpop.f32.mrb[47].mxu0  ;;  %v1262_v4 = vmul.f32 %v1225_v30, %v1034_v15 }
 0x2e1   :  { %v1029_v24 = vadd.f32 %v2306_v21, %v1028_v19  ;;  %v1260_v22 = vmul.f32 %v1215_v8, %v1026_v17 }
 0x2e2   :  { %v1263_v10 = vmul.f32 %v1230_v20, %v1037_v55 }
 0x2e3   :  { %v1261_v23 = vmul.f32 %v1220_v7, %v1029_v24 }
 0x2e4   :  { %v1624_v25 = vpack.c.bf16 %v1263_v10, %v1262_v4 }
 0x2e5   :  { %v1619_v26 = vpack.c.bf16 %v1261_v23, %v1260_v22 }
 0x2e6   :  { %1640 = vst [vmem:[%s2396_s8 + $0x78] sm:$0xff] %v1624_v25  }
 0x2e7   :  { %1639 = vst [vmem:[%s2396_s8 + $0x70] sm:$0xff] %v1619_v26  }

</bundles_post_ra>
